<compile_context>
chip_gen: v6e
topology: v6e:2x2x1
jax: 0.10.0
libtpu: 0.0.40
codegen_flags: <defaults>
</compile_context>

<pallas_src>
import functools

import jax
import jax.numpy as jnp
from jax import lax
from jax.experimental import pallas as pl
from jax.experimental.pallas import tpu as pltpu


LAMBDA_PARAM = 0.3
NOISE_SIGMA = 0.05          # error_simulator magnitude (deterministic, seeded)

_LANES = 128
_SUBLANES = 8


def _wang_hash_u32(x):
    """Cheap per-element integer hash (uint32 -> uint32), pure VPU ops."""
    x = (x ^ jnp.uint32(61)) ^ (x >> 16)
    x = x * jnp.uint32(9)
    x = x ^ (x >> 4)
    x = x * jnp.uint32(0x27D4EB2D)
    x = x ^ (x >> 15)
    return x


def _uniform_noise(gidx_i32, seed_u32, sigma):
    """Deterministic uniform noise in [-sigma, +sigma) from a global index."""
    h = _wang_hash_u32(gidx_i32.astype(jnp.uint32) ^ seed_u32)
    # 23 high bits -> [0, 1); scale/shift folded into one mul + one sub.
    u = (h >> 9).astype(jnp.int32).astype(jnp.float32)
    return u * jnp.float32(2.0 * sigma / (1 << 23)) - jnp.float32(sigma)


def _error_aware_loss_kernel(seed_ref,              # scalar-prefetch (SMEM)
                             x_ref, t_ref,          # (tile_m, 128) inputs
                             base_ref, pert_ref,    # (8, 128) resident accumulators
                             *, sigma, n_valid, tile_m, inner_blocks):
    c = pl.program_id(0)          # per-core partial (parallel axis)
    i = pl.program_id(1)          # reduction axis (arbitrary / sequential)

    # Initialize the VMEM-resident accumulators on the first reduction step.
    @pl.when(i == 0)
    def _():
        base_ref[...] = jnp.zeros_like(base_ref)
        pert_ref[...] = jnp.zeros_like(pert_ref)

    x = x_ref[...].astype(jnp.float32)
    t = t_ref[...].astype(jnp.float32)
    d = x - t

    # ---- error simulator: deterministic uniform noise from a hash of the ----
    # ---- global element index (independent of tiling / core split)       ----
    block_idx = c * inner_blocks + i
    base_off = block_idx * (tile_m * _LANES)
    rows = lax.broadcasted_iota(jnp.int32, (tile_m, _LANES), 0)
    cols = lax.broadcasted_iota(jnp.int32, (tile_m, _LANES), 1)
    gidx = base_off + rows * _LANES + cols

    noise = _uniform_noise(gidx, seed_ref[0].astype(jnp.uint32), sigma)
    # Zero the noise on padded elements so they contribute nothing
    # (x and t are zero-padded, so d is already 0 there).
    noise = jnp.where(gidx < n_valid, noise, 0.0)

    dp = d + noise                    # (x + noise) - t, reusing d

    # ---- per-tile accumulation: pure VPU adds into (8, 128) accumulators ----
    groups = tile_m // _SUBLANES
    base_ref[...] += jnp.sum((d * d).reshape(groups, _SUBLANES, _LANES), axis=0)
    pert_ref[...] += jnp.sum((dp * dp).reshape(groups, _SUBLANES, _LANES), axis=0)


def error_aware_loss(x, target, *, seed=0, lambda_param=LAMBDA_PARAM,
                     sigma=NOISE_SIGMA, max_tile_m=1024):
    """ErrorAwareLoss forward pass. x / target: same-shape float arrays (e.g. NCHW)."""
    assert x.shape == target.shape
    n = x.size

    # Flatten and zero-pad to a multiple of 8*128 so every block is (8k, 128).
    chunk = _SUBLANES * _LANES
    n_pad = ((n + chunk - 1) // chunk) * chunk
    xf = jnp.ravel(x)
    tf = jnp.ravel(target)
    if n_pad != n:
        pad = n_pad - n
        xf = jnp.concatenate([xf, jnp.zeros((pad,), xf.dtype)])
        tf = jnp.concatenate([tf, jnp.zeros((pad,), tf.dtype)])
    m = n_pad // _LANES
    x2 = xf.reshape(m, _LANES)
    t2 = tf.reshape(m, _LANES)

    # Largest multiple-of-8 row tile that divides m, capped at max_tile_m.
    tile_m = min(max_tile_m, m)
    tile_m -= tile_m % _SUBLANES
    while m % tile_m != 0:
        tile_m -= _SUBLANES
    n_blocks = m // tile_m

    # Split the reduction into 2 partials (sharded across TCs on v7x).
    n_par = 2 if (n_blocks >= 2 and n_blocks % 2 == 0) else 1
    inner = n_blocks // n_par

    seed_arr = jnp.asarray([seed], dtype=jnp.int32)

    kernel = functools.partial(
        _error_aware_loss_kernel,
        sigma=float(sigma), n_valid=int(n),
        tile_m=tile_m, inner_blocks=inner)

    in_map = lambda c, i, seed: (c * inner + i, 0)
    out_map = lambda c, i, seed: (c, 0)

    base_p, pert_p = pl.pallas_call(
        kernel,
        out_shape=(jax.ShapeDtypeStruct((n_par * _SUBLANES, _LANES), jnp.float32),
                   jax.ShapeDtypeStruct((n_par * _SUBLANES, _LANES), jnp.float32)),
        grid_spec=pltpu.PrefetchScalarGridSpec(
            num_scalar_prefetch=1,
            grid=(n_par, inner),
            in_specs=[
                pl.BlockSpec((tile_m, _LANES), in_map),
                pl.BlockSpec((tile_m, _LANES), in_map),
            ],
            out_specs=(
                pl.BlockSpec((_SUBLANES, _LANES), out_map),
                pl.BlockSpec((_SUBLANES, _LANES), out_map),
            ),
        ),
        compiler_params=pltpu.CompilerParams(
            dimension_semantics=("parallel", "arbitrary")),
        cost_estimate=pl.CostEstimate(
            flops=12 * n_pad,
            transcendentals=0,
            bytes_accessed=2 * n_pad * x2.dtype.itemsize),
    )(seed_arr, x2, t2)

    inv_n = 1.0 / float(n)
    base = jnp.sum(base_p) * inv_n                 # MSE(input, target)
    pert = jnp.sum(pert_p) * inv_n                 # MSE(perturbed, target)
    # torch.no_grad penalty path -> treat as a constant (forward value identical).
    penalty = lax.stop_gradient(pert - base)
    # TODO(synk): base_loss / error_simulator are user-supplied modules in the
    # PyTorch spec; instantiated here as MSE + deterministic uniform-noise injection.
    return base + lambda_param * penalty


def _reference_loss(x, target, *, seed=0, lambda_param=LAMBDA_PARAM,
                    sigma=NOISE_SIGMA):
    """Pure-JAX reference with the identical deterministic noise realization."""
    xf = jnp.ravel(x).astype(jnp.float32)
    tf = jnp.ravel(target).astype(jnp.float32)
    gidx = jnp.arange(xf.size, dtype=jnp.int32)
    noise = _uniform_noise(gidx, jnp.uint32(seed), float(sigma))
    base = jnp.mean((xf - tf) ** 2)
    pert = jnp.mean((xf + noise - tf) ** 2)
    return base + lambda_param * (pert - base)


if __name__ == "__main__":
    key = jax.random.PRNGKey(0)
    kx, kt = jax.random.split(key)
    # Small NCHW shapes consistent with a conv-style model's loss inputs.
    x = jax.random.normal(kx, (2, 4, 16, 16), dtype=jnp.float32)
    target = jax.random.normal(kt, (2, 4, 16, 16), dtype=jnp.float32)

    loss = error_aware_loss(x, target, seed=0)
    jax.block_until_ready(loss)

    # Sanity: finite scalar matching the pure-JAX reference.
    assert loss.shape == ()
    assert bool(jnp.isfinite(loss))
    ref = _reference_loss(x, target, seed=0)
    assert bool(jnp.allclose(loss, ref, rtol=1e-3, atol=1e-5)), (loss, ref)

    print("KERNEL_OK")
</pallas_src>

<mosaic_0001>
module attributes {stable_mosaic.version = 11 : i64} {
  func.func @_error_aware_loss_kernel(%arg0: i32, %arg1: i32, %arg2: memref<1xi32, #tpu.memory_space<smem>>, %arg3: memref<16x128xf32, #tpu.memory_space<vmem>>, %arg4: memref<16x128xf32, #tpu.memory_space<vmem>>, %arg5: memref<8x128xf32, #tpu.memory_space<vmem>>, %arg6: memref<8x128xf32, #tpu.memory_space<vmem>>) attributes {dimension_semantics = [#tpu.dimension_semantics<parallel>, #tpu.dimension_semantics<arbitrary>], iteration_bounds = array<i64: 1, 1>, scalar_prefetch = 1 : i64, scratch_operands = 0 : i64, tpu.core_type = #tpu.core_type<tc>, window_params = [{transform_indices = @transform_0, window_bounds = array<i64: 16, 128>}, {transform_indices = @transform_1, window_bounds = array<i64: 16, 128>}, {transform_indices = @transform_2, window_bounds = array<i64: 8, 128>}, {transform_indices = @transform_3, window_bounds = array<i64: 8, 128>}]} {
    %c0_i32 = arith.constant 0 : i32
    %0 = arith.cmpi eq, %arg1, %c0_i32 : i32
    %1 = arith.extui %0 : i1 to i32
    %c0_i32_0 = arith.constant 0 : i32
    %2 = arith.cmpi ne, %1, %c0_i32_0 : i32
    scf.if %2 {
      %cst_19 = arith.constant 0.000000e+00 : f32
      %58 = vector.broadcast %cst_19 : f32 to vector<8x128xf32>
      %c0_20 = arith.constant 0 : index
      %c0_21 = arith.constant 0 : index
      %59 = vector.load %arg5[%c0_20, %c0_21] : memref<8x128xf32, #tpu.memory_space<vmem>>, vector<8x128xf32>
      tpu.vector_store %arg5[%c0_20, %c0_21], %58 {strides = array<i32>} : memref<8x128xf32, #tpu.memory_space<vmem>>, vector<8x128xf32>,
      %cst_22 = arith.constant 0.000000e+00 : f32
      %60 = vector.broadcast %cst_22 : f32 to vector<8x128xf32>
      %c0_23 = arith.constant 0 : index
      %c0_24 = arith.constant 0 : index
      %61 = vector.load %arg6[%c0_23, %c0_24] : memref<8x128xf32, #tpu.memory_space<vmem>>, vector<8x128xf32>
      tpu.vector_store %arg6[%c0_23, %c0_24], %60 {strides = array<i32>} : memref<8x128xf32, #tpu.memory_space<vmem>>, vector<8x128xf32>,
    } else {
    }
    %c0 = arith.constant 0 : index
    %c0_1 = arith.constant 0 : index
    %3 = vector.load %arg3[%c0, %c0_1] : memref<16x128xf32, #tpu.memory_space<vmem>>, vector<16x128xf32>
    %c0_2 = arith.constant 0 : index
    %c0_3 = arith.constant 0 : index
    %4 = vector.load %arg4[%c0_2, %c0_3] : memref<16x128xf32, #tpu.memory_space<vmem>>, vector<16x128xf32>
    %5 = arith.subf %3, %4 : vector<16x128xf32>
    %c1_i32 = arith.constant 1 : i32
    %6 = arith.muli %arg0, %c1_i32 : i32
    %7 = arith.addi %6, %arg1 : i32
    %c2048_i32 = arith.constant 2048 : i32
    %8 = arith.muli %7, %c2048_i32 : i32
    %9 = tpu.iota {dimensions = array<i32: 0>} : vector<16x128xi32>
    %10 = tpu.iota {dimensions = array<i32: 1>} : vector<16x128xi32>
    %c128_i32 = arith.constant 128 : i32
    %11 = vector.broadcast %c128_i32 : i32 to vector<16x128xi32>
    %12 = arith.muli %9, %11 : vector<16x128xi32>
    %13 = vector.broadcast %8 : i32 to vector<16x128xi32>
    %14 = arith.addi %13, %12 : vector<16x128xi32>
    %15 = arith.addi %14, %10 : vector<16x128xi32>
    %c0_4 = arith.constant 0 : index
    %16 = memref.load %arg2[%c0_4] : memref<1xi32, #tpu.memory_space<smem>>
    %17 = vector.broadcast %16 : i32 to vector<16x128xi32>
    %18 = arith.xori %15, %17 : vector<16x128xi32>
    %c61_i32 = arith.constant 61 : i32
    %19 = vector.broadcast %c61_i32 : i32 to vector<16x128xi32>
    %20 = arith.xori %18, %19 : vector<16x128xi32>
    %c16_i32 = arith.constant 16 : i32
    %21 = vector.broadcast %c16_i32 : i32 to vector<16x128xi32>
    %22 = arith.shrui %18, %21 : vector<16x128xi32>
    %23 = arith.xori %20, %22 : vector<16x128xi32>
    %c9_i32 = arith.constant 9 : i32
    %24 = vector.broadcast %c9_i32 : i32 to vector<16x128xi32>
    %25 = arith.muli %23, %24 : vector<16x128xi32>
    %c4_i32 = arith.constant 4 : i32
    %26 = vector.broadcast %c4_i32 : i32 to vector<16x128xi32>
    %27 = arith.shrui %25, %26 : vector<16x128xi32>
    %28 = arith.xori %25, %27 : vector<16x128xi32>
    %c668265261_i32 = arith.constant 668265261 : i32
    %29 = vector.broadcast %c668265261_i32 : i32 to vector<16x128xi32>
    %30 = arith.muli %28, %29 : vector<16x128xi32>
    %c15_i32 = arith.constant 15 : i32
    %31 = vector.broadcast %c15_i32 : i32 to vector<16x128xi32>
    %32 = arith.shrui %30, %31 : vector<16x128xi32>
    %33 = arith.xori %30, %32 : vector<16x128xi32>
    %c9_i32_5 = arith.constant 9 : i32
    %34 = vector.broadcast %c9_i32_5 : i32 to vector<16x128xi32>
    %35 = arith.shrui %33, %34 : vector<16x128xi32>
    %36 = arith.sitofp %35 : vector<16x128xi32> to vector<16x128xf32>
    %cst = arith.constant 1.19209291E-8 : f32
    %37 = vector.broadcast %cst : f32 to vector<16x128xf32>
    %38 = arith.mulf %36, %37 : vector<16x128xf32>
    %cst_6 = arith.constant 5.000000e-02 : f32
    %39 = vector.broadcast %cst_6 : f32 to vector<16x128xf32>
    %40 = arith.subf %38, %39 : vector<16x128xf32>
    %c2048_i32_7 = arith.constant 2048 : i32
    %41 = vector.broadcast %c2048_i32_7 : i32 to vector<16x128xi32>
    %42 = arith.cmpi slt, %15, %41 : vector<16x128xi32>
    %cst_8 = arith.constant 0.000000e+00 : f32
    %43 = vector.broadcast %cst_8 : f32 to vector<16x128xf32>
    %44 = arith.select %42, %40, %43 : vector<16x128xi1>, vector<16x128xf32>
    %45 = arith.addf %5, %44 : vector<16x128xf32>
    %c0_9 = arith.constant 0 : index
    %c0_10 = arith.constant 0 : index
    %46 = vector.load %arg5[%c0_9, %c0_10] : memref<8x128xf32, #tpu.memory_space<vmem>>, vector<8x128xf32>
    %47 = arith.mulf %5, %5 : vector<16x128xf32>
    %48 = vector.shape_cast %47 : vector<16x128xf32> to vector<2x8x128xf32>
    %cst_11 = arith.constant dense<0.000000e+00> : vector<8x128xf32>
    %49 = vector.multi_reduction <add>, %48, %cst_11 [0] : vector<2x8x128xf32> to vector<8x128xf32>
    %50 = arith.addf %46, %49 : vector<8x128xf32>
    %c0_12 = arith.constant 0 : index
    %c0_13 = arith.constant 0 : index
    %51 = vector.load %arg5[%c0_12, %c0_13] : memref<8x128xf32, #tpu.memory_space<vmem>>, vector<8x128xf32>
    tpu.vector_store %arg5[%c0_12, %c0_13], %50 {strides = array<i32>} : memref<8x128xf32, #tpu.memory_space<vmem>>, vector<8x128xf32>,
    %c0_14 = arith.constant 0 : index
    %c0_15 = arith.constant 0 : index
    %52 = vector.load %arg6[%c0_14, %c0_15] : memref<8x128xf32, #tpu.memory_space<vmem>>, vector<8x128xf32>
    %53 = arith.mulf %45, %45 : vector<16x128xf32>
    %54 = vector.shape_cast %53 : vector<16x128xf32> to vector<2x8x128xf32>
    %cst_16 = arith.constant dense<0.000000e+00> : vector<8x128xf32>
    %55 = vector.multi_reduction <add>, %54, %cst_16 [0] : vector<2x8x128xf32> to vector<8x128xf32>
    %56 = arith.addf %52, %55 : vector<8x128xf32>
    %c0_17 = arith.constant 0 : index
    %c0_18 = arith.constant 0 : index
    %57 = vector.load %arg6[%c0_17, %c0_18] : memref<8x128xf32, #tpu.memory_space<vmem>>, vector<8x128xf32>
    tpu.vector_store %arg6[%c0_17, %c0_18], %56 {strides = array<i32>} : memref<8x128xf32, #tpu.memory_space<vmem>>, vector<8x128xf32>,
    return
  }
  func.func @transform_0(%arg0: i32, %arg1: i32, %arg2: memref<1xi32, #tpu.memory_space<smem>>) -> (i32, i32) {
    %c1_i32 = arith.constant 1 : i32
    %0 = arith.muli %arg0, %c1_i32 : i32
    %1 = arith.addi %0, %arg1 : i32
    %c0_i32 = arith.constant 0 : i32
    %c0_i32_0 = arith.constant 0 : i32
    return %1, %c0_i32 : i32, i32
  }
  func.func @transform_1(%arg0: i32, %arg1: i32, %arg2: memref<1xi32, #tpu.memory_space<smem>>) -> (i32, i32) {
    %c1_i32 = arith.constant 1 : i32
    %0 = arith.muli %arg0, %c1_i32 : i32
    %1 = arith.addi %0, %arg1 : i32
    %c0_i32 = arith.constant 0 : i32
    %c0_i32_0 = arith.constant 0 : i32
    return %1, %c0_i32 : i32, i32
  }
  func.func @transform_2(%arg0: i32, %arg1: i32, %arg2: memref<1xi32, #tpu.memory_space<smem>>) -> (i32, i32) {
    %c0_i32 = arith.constant 0 : i32
    %c0_i32_0 = arith.constant 0 : i32
    return %arg0, %c0_i32 : i32, i32
  }
  func.func @transform_3(%arg0: i32, %arg1: i32, %arg2: memref<1xi32, #tpu.memory_space<smem>>) -> (i32, i32) {
    %c0_i32 = arith.constant 0 : i32
    %c0_i32_0 = arith.constant 0 : i32
    return %arg0, %c0_i32 : i32, i32
  }
}

</mosaic_0001>

<bundles_post_ra>
// kernel: tpu_custom_call.1
= control target key start
LH: loop header
LB: loop body
LE: loop exit
PB: predicated region body
PF: predicated region fallthrough
CT: control target
= control target key end

     0   :  { %11 = vsyncpa [#allocation5], 0  ;;  %s304_s0 = inlined_call_operand.<no memory space> [shape: s32[1], index: 0, kind: input, shape index: {}]   ;;  %s305_s1 = inlined_call_operand.hbm [shape: f32[16,128], index: 1, kind: input, shape index: {}]   ;;  %s306_s2 = inlined_call_operand.hbm [shape: f32[16,128], index: 2, kind: input, shape index: {}]   ;;  %s307_s3 = inlined_call_operand.hbm [shape: f32[8,128], index: 3, kind: output, shape index: {0}]   ;;  %s308_s4 = inlined_call_operand.hbm [shape: f32[8,128], index: 4, kind: output, shape index: {1}]  }
   0x1   :  { %12 = vsyncpa [#allocation8], 0 }
   0x2   :  { %13 = vsyncpa [#allocation6], 0 }
   0x3   :  { %14 = vsyncpa [#allocation11], 0  ;;  %s258_s15 = smov [#allocation4]  }
   0x4   :  { %s24_s16 = sshll.u32 %s258_s15, 4  ;;  %s25_s16 = int_to_ptr.vmem [resolvable:$true] %s24_s16 }
   0x5   :  { %s178_s17 = scalar_lea.vmem %s25_s16, 256  ;;  %p183_p1 = scmp.lt.s32.totalorder %s25_s16, %s25_s16 }
   0x6   :  { %p179_p0 = scmp.ne.s32.totalorder %s25_s16, %s178_s17  ;;  %p184_p2 = scmp.lt.s32.totalorder %s178_s17, %s178_s17 }
   0x8   :  { %p185_p3 = por %p184_p2, %p183_p1 }
   0xa   :  { %p186_p4 = pnand %p185_p3, %p179_p0 }
   0xc   :  { %189 = shalt.err (!%p186_p4)
}
   0xd   :  { %s259_s18 = smov 128   ;;  %s260_s19 = smov 8  }
   0xe   :  { %30 = dma.hbm_to_vmem [thread:$0]  %s305_s1, 256, %s25_s16, [#allocation5], %s259_s18, %s259_s18, %s260_s19  }
   0xf   :  { %s261_s22 = smov [#allocation7]  }
  0x10   :  { %s40_s23 = sshll.u32 %s261_s22, 4  ;;  %s41_s23 = int_to_ptr.vmem [resolvable:$true] %s40_s23 }
  0x11   :  { %s198_s24 = scalar_lea.vmem %s41_s23, 256  ;;  %p203_p6 = scmp.lt.s32.totalorder %s41_s23, %s41_s23 }
  0x12   :  { %p199_p5 = scmp.ne.s32.totalorder %s41_s23, %s198_s24  ;;  %p204_p7 = scmp.lt.s32.totalorder %s198_s24, %s198_s24 }
  0x14   :  { %p205_p8 = por %p204_p7, %p203_p6 }
  0x16   :  { %p206_p9 = pnand %p205_p8, %p199_p5 }
  0x18   :  { %209 = shalt.err (!%p206_p9)
}
  0x19   :  { %46 = dma.hbm_to_vmem [thread:$0]  %s306_s2, 256, %s41_s23, [#allocation8], %s259_s18, %s259_s18, %s260_s19  }
  0x1a   :  { %250 = dma.done.wait [#allocation5], 256  }
  0x1b   :  { %251 = vsyncadd [#allocation5], 4294967040 }
  0x1c   :  { %252 = dma.done.wait [#allocation8], 256  }
  0x1d   :  { %253 = vsyncadd [#allocation8], 4294967040  ;;  %v71_v0 = vlaneseq  ;;  %v84_v5 = vstv %s304_s0  ;;  %v63_v8 = vld [vmem:[#allocation4] sm:$0xff]  ;;  %v64_v9 = vld [vmem:[#allocation4 + $0x8] sm:$0xff]  ;;  %s262_s2 = smov [#allocation9]  }
  0x1e   :  { %v65_v10 = vld [vmem:[#allocation7] sm:$0xff]  ;;  %v66_v11 = vld [vmem:[#allocation7 + $0x8] sm:$0xff]  ;;  %s137_s0 = sshll.u32 %s262_s2, 4  ;;  %s138_s0 = int_to_ptr.vmem [resolvable:$true] %s137_s0 }
  0x1f   :  { %v72_v1 = vshrl.u32 %v71_v0, 7  ;;  %v75_v2 = vand.u32 127, %v71_v0  ;;  %v67_v12 = vsub.f32 %v63_v8, %v65_v10  ;;  %v68_v15 = vsub.f32 %v64_v9, %v66_v11  ;;  %s210_s28 = scalar_lea.vmem %s138_s0, 128  ;;  %p215_p11 = scmp.lt.s32.totalorder %s138_s0, %s138_s0 }
  0x20   :  { %p211_p10 = scmp.ne.s32.totalorder %s138_s0, %s210_s28  ;;  %p216_p12 = scmp.lt.s32.totalorder %s210_s28, %s210_s28 }
  0x21   :  { %v73_v3 = vadd.s32 8, %v72_v1  ;;  %v76_v4 = vmul.u32 128, %v72_v1  ;;  %v120_v16 = vmul.f32 %v67_v12, %v67_v12  ;;  %v121_v20 = vmul.f32 %v68_v15, %v68_v15 }
  0x22   :  { %p217_p13 = por %p216_p12, %p215_p11 }
  0x23   :  { %v77_v6 = vmul.u32 128, %v73_v3  ;;  %v81_v7 = vadd.s32 %v76_v4, %v75_v2  ;;  %v122_v24 = vadd.f32 %v121_v20, %v120_v16 }
  0x24   :  { %p218_p0 = pnand %p217_p13, %p211_p10 }
  0x25   :  { %v82_v13 = vadd.s32 %v77_v6, %v75_v2  ;;  %v85_v14 = vxor.u32 %v84_v5, %v81_v7  ;;  %124 = vst [vmem:[#allocation9] sm:$0xff] %v122_v24 }
  0x27   :  { %v86_v17 = vxor.u32 %v84_v5, %v82_v13  ;;  %v87_v18 = vxor.u32 61, %v85_v14  ;;  %v89_v19 = vshrl.u32 %v85_v14, 16 }
  0x29   :  { %v88_v21 = vxor.u32 61, %v86_v17  ;;  %v90_v22 = vshrl.u32 %v86_v17, 16  ;;  %v91_v23 = vxor.u32 %v89_v19, %v87_v18 }
  0x2b   :  { %v92_v25 = vxor.u32 %v90_v22, %v88_v21  ;;  %v93_v26 = vmul.u32 9, %v91_v23 }
  0x2d   :  { %v94_v27 = vmul.u32 9, %v92_v25  ;;  %v95_v28 = vshrl.u32 %v93_v26, 4 }
  0x2f   :  { %v96_v29 = vshrl.u32 %v94_v27, 4  ;;  %v97_v30 = vxor.u32 %v95_v28, %v93_v26 }
  0x30   :  { %221 = shalt.err (!%p218_p0)
}
  0x31   :  { %140 = dma.vmem_to_hbm [thread:$0]  %s138_s0, 128, %s307_s3, [#allocation6]   ;;  %v98_v31 = vxor.u32 %v96_v29, %v94_v27  ;;  %v99_v32 = vmul.u32 668265261, %v97_v30  ;;  %vm113_vm0 = vcmp.lt.s32.totalorder %v81_v7, 2048  ;;  %vm114_vm1 = vcmp.lt.s32.totalorder %v82_v13, 2048 }
  0x32   :  { %s263_s3 = smov [#allocation10]  }
  0x33   :  { %v100_v33 = vmul.u32 668265261, %v98_v31  ;;  %v101_v34 = vshrl.u32 %v99_v32, 15  ;;  %s147_s5 = sshll.u32 %s263_s3, 4  ;;  %s148_s5 = int_to_ptr.vmem [resolvable:$true] %s147_s5 }
  0x34   :  { %s230_s6 = scalar_lea.vmem %s148_s5, 128  ;;  %p235_p2 = scmp.lt.s32.totalorder %s148_s5, %s148_s5 }
  0x35   :  { %v102_v35 = vshrl.u32 %v100_v33, 15  ;;  %v103_v36 = vxor.u32 %v101_v34, %v99_v32  ;;  %p231_p1 = scmp.ne.s32.totalorder %s148_s5, %s230_s6  ;;  %p236_p3 = scmp.lt.s32.totalorder %s230_s6, %s230_s6 }
  0x37   :  { %v104_v37 = vxor.u32 %v102_v35, %v100_v33  ;;  %v105_v38 = vshrl.u32 %v103_v36, 9  ;;  %p237_p4 = por %p236_p3, %p235_p2 }
  0x39   :  { %v106_v39 = vshrl.u32 %v104_v37, 9  ;;  %v107_v40 = vcvt.s32.f32 %v105_v38  ;;  %p238_p5 = pnand %p237_p4, %p231_p1 }
  0x3b   :  { %v108_v41 = vcvt.s32.f32 %v106_v39  ;;  %v109_v42 = vmul.f32 1.1920929e-08, %v107_v40 }
  0x3d   :  { %v110_v43 = vmul.f32 1.1920929e-08, %v108_v41  ;;  %v161_v44 = vadd.f32 -0.05, %v109_v42 }
  0x3f   :  { %v162_v45 = vadd.f32 -0.05, %v110_v43  ;;  %v115_v46 = vsel %vm113_vm0, %v161_v44, 0.0 }
  0x40   :  { %v117_v47 = vadd.f32 %v115_v46, %v67_v12 }
  0x41   :  { %v116_v48 = vsel %vm114_vm1, %v162_v45, 0.0 }
  0x42   :  { %v118_v49 = vadd.f32 %v116_v48, %v68_v15  ;;  %v126_v50 = vmul.f32 %v117_v47, %v117_v47 }
  0x44   :  { %v127_v51 = vmul.f32 %v118_v49, %v118_v49 }
  0x46   :  { %v128_v52 = vadd.f32 %v127_v51, %v126_v50 }
  0x48   :  { %130 = vst [vmem:[#allocation10] sm:$0xff] %v128_v52 }
  0x49   :  { %241 = shalt.err (!%p238_p5)
}
  0x4a   :  { %150 = dma.vmem_to_hbm [thread:$0]  %s148_s5, 128, %s308_s4, [#allocation11]  }
  0x4b   :  { %254 = dma.done.wait [#allocation6], 128  }
  0x4c   :  { %255 = vsyncadd [#allocation6], 4294967168 }
  0x4d   :  { %256 = dma.done.wait [#allocation11], 128  }
  0x4e   :  { %257 = vsyncadd [#allocation11], 4294967168 }
  0x4f   :  { %157 = vsyncpa [#allocation5], 1 }
  0x50   :  { %158 = vsyncpa [#allocation8], 1 }
  0x51   :  { %159 = vsyncpa [#allocation6], 1 }
  0x52   :  { %160 = vsyncpa [#allocation11], 1 }

</bundles_post_ra>
